<compile_context>
chip_gen: v6e
topology: v6e:2x2x1
jax: 0.10.0
libtpu: 0.0.40
codegen_flags: <defaults>
</compile_context>

<pallas_src>
import math
from functools import partial

import jax
import jax.numpy as jnp
from jax.experimental import pallas as pl
from jax.experimental.pallas import tpu as pltpu


# ----------------------------------------------------------------------------
# helpers
# ----------------------------------------------------------------------------
def _round_up(x, m):
    return (x + m - 1) // m * m


def _compiler_params():
    cp_cls = getattr(pltpu, "CompilerParams", None)
    if cp_cls is None:  # very old jax fallback
        cp_cls = getattr(pltpu, "TPUCompilerParams")
    return cp_cls(
        dimension_semantics=("parallel",),
        vmem_limit_bytes=48 * 1024 * 1024,
    )


# ----------------------------------------------------------------------------
# Pallas kernel 1: out = relu_maybe(x @ w + b)   (bf16 MXU, f32 accumulate)
# ----------------------------------------------------------------------------
def _matmul_bias_kernel(x_ref, w_ref, b_ref, o_ref, *, relu):
    acc = jnp.dot(x_ref[...], w_ref[...], preferred_element_type=jnp.float32)
    acc = acc + b_ref[...]                      # (1, Np) broadcast over rows
    if relu:
        acc = jnp.maximum(acc, 0.0)
    o_ref[...] = acc.astype(o_ref.dtype)


def matmul_bias(x, w, b, *, relu, out_dtype=jnp.float32, tile_m=256):
    """x: (M, K), w: (K, N), b: (N,) -> (M, N).

    M is tiled over a 1-D grid; w/b have constant index_maps (resident in VMEM).
    N is padded to a multiple of 128 for lane-dense stores; the pad is sliced off.
    """
    M, K = x.shape
    K2, N = w.shape
    assert K == K2

    Np = _round_up(N, 128)
    tm = min(tile_m, _round_up(M, 16))          # bf16 sublane packing
    Mp = _round_up(M, tm)

    x_p = x.astype(jnp.bfloat16)
    if Mp != M:
        x_p = jnp.pad(x_p, ((0, Mp - M), (0, 0)))
    w_p = w.astype(jnp.bfloat16)
    b_p = b.astype(jnp.float32)
    if Np != N:
        w_p = jnp.pad(w_p, ((0, 0), (0, Np - N)))
        b_p = jnp.pad(b_p, (0, Np - N))
    b_p = b_p.reshape(1, Np)

    out = pl.pallas_call(
        partial(_matmul_bias_kernel, relu=relu),
        out_shape=jax.ShapeDtypeStruct((Mp, Np), out_dtype),
        grid=(Mp // tm,),
        in_specs=[
            pl.BlockSpec((tm, K), lambda i: (i, 0)),   # activation tile
            pl.BlockSpec((K, Np), lambda i: (0, 0)),   # resident weights
            pl.BlockSpec((1, Np), lambda i: (0, 0)),   # resident bias
        ],
        out_specs=pl.BlockSpec((tm, Np), lambda i: (i, 0)),
        compiler_params=_compiler_params(),
    )(x_p, w_p, b_p)
    return out[:M, :N]


# ----------------------------------------------------------------------------
# Pallas kernel 2: fused FC head  q = relu(x @ w1 + b1) @ w2 + b2
# ----------------------------------------------------------------------------
def _fc_head_kernel(x_ref, w1_ref, b1_ref, w2_ref, b2_ref, o_ref):
    h = jnp.dot(x_ref[...], w1_ref[...], preferred_element_type=jnp.float32)
    h = jnp.maximum(h + b1_ref[...], 0.0)
    q = jnp.dot(h.astype(w2_ref.dtype), w2_ref[...],
                preferred_element_type=jnp.float32)
    o_ref[...] = (q + b2_ref[...]).astype(o_ref.dtype)


def fc_head(x, w1, b1, w2, b2, *, tile_m=256):
    """x: (M, K), w1: (K, H), w2: (H, A) -> (M, A). Hidden stays in VMEM."""
    M, K = x.shape
    _, H = w1.shape
    _, A = w2.shape

    Ap = _round_up(A, 128)
    tm = min(tile_m, _round_up(M, 16))
    Mp = _round_up(M, tm)

    x_p = x.astype(jnp.bfloat16)
    if Mp != M:
        x_p = jnp.pad(x_p, ((0, Mp - M), (0, 0)))
    w2_p = w2.astype(jnp.bfloat16)
    b2_p = b2.astype(jnp.float32)
    if Ap != A:
        w2_p = jnp.pad(w2_p, ((0, 0), (0, Ap - A)))
        b2_p = jnp.pad(b2_p, (0, Ap - A))

    out = pl.pallas_call(
        _fc_head_kernel,
        out_shape=jax.ShapeDtypeStruct((Mp, Ap), jnp.float32),
        grid=(Mp // tm,),
        in_specs=[
            pl.BlockSpec((tm, K), lambda i: (i, 0)),
            pl.BlockSpec((K, H), lambda i: (0, 0)),
            pl.BlockSpec((1, H), lambda i: (0, 0)),
            pl.BlockSpec((H, Ap), lambda i: (0, 0)),
            pl.BlockSpec((1, Ap), lambda i: (0, 0)),
        ],
        out_specs=pl.BlockSpec((tm, Ap), lambda i: (i, 0)),
        compiler_params=_compiler_params(),
    )(x_p, w1.astype(jnp.bfloat16), b1.astype(jnp.float32).reshape(1, H),
      w2_p, b2_p.reshape(1, Ap))
    return out[:M, :A]


# ----------------------------------------------------------------------------
# Conv2d (stride, optional padding) via channels-last im2col + Pallas matmul
# ----------------------------------------------------------------------------
def conv2d_relu(x, w_mat, b, *, kh, kw, stride, padding=0):
    """x: (N, H, W, C) bf16/f32; w_mat: (kh*kw*C, OutC); returns (N, OH, OW, OutC)."""
    if padding:
        x = jnp.pad(x, ((0, 0), (padding, padding), (padding, padding), (0, 0)))
    n, h, w_sz, c = x.shape
    oh = (h - kh) // stride + 1
    ow = (w_sz - kw) // stride + 1
    # im2col: C stays contiguous in lanes; patch column order = (i*kw + j)*C + c,
    # matching the pre-folded weight layout.
    cols = [x[:, i:i + stride * oh:stride, j:j + stride * ow:stride, :]
            for i in range(kh) for j in range(kw)]
    p = jnp.stack(cols, axis=3).reshape(n * oh * ow, kh * kw * c)
    out = matmul_bias(p, w_mat, b, relu=True, out_dtype=jnp.bfloat16)
    return out.reshape(n, oh, ow, -1)


# ----------------------------------------------------------------------------
# Parameter init (PyTorch layout, kaiming_uniform relu gain, zero biases)
# ----------------------------------------------------------------------------
def _kaiming_uniform(key, shape, fan_in):
    gain = math.sqrt(2.0)                       # nonlinearity='relu', a=0.0
    bound = gain * math.sqrt(3.0 / fan_in)
    return jax.random.uniform(key, shape, jnp.float32, -bound, bound)


def _out_sz(s, k, st, p=0):
    return (s + 2 * p - k) // st + 1


def init_dqn_params(key, input_shape, num_actions):
    """PyTorch-layout parameters (OIHW convs, (out,in) linears)."""
    c_in, h, w = input_shape
    ks = jax.random.split(key, 5)

    conv1_w = _kaiming_uniform(ks[0], (32, c_in, 8, 8), c_in * 8 * 8)
    conv2_w = _kaiming_uniform(ks[1], (64, 32, 4, 4), 32 * 4 * 4)
    conv3_w = _kaiming_uniform(ks[2], (64, 64, 3, 3), 64 * 3 * 3)

    p1 = 2 if h == 105 else 0
    oh = _out_sz(_out_sz(_out_sz(h, 8, 4, p1), 4, 2), 3, 1)
    ow = _out_sz(_out_sz(_out_sz(w, 8, 4, p1), 4, 2), 3, 1)
    feat = 64 * oh * ow

    fc1_w = _kaiming_uniform(ks[3], (512, feat), feat)
    fc2_w = _kaiming_uniform(ks[4], (num_actions, 512), 512)

    return dict(conv1_w=conv1_w, conv1_b=jnp.zeros((32,), jnp.float32),
                conv2_w=conv2_w, conv2_b=jnp.zeros((64,), jnp.float32),
                conv3_w=conv3_w, conv3_b=jnp.zeros((64,), jnp.float32),
                fc1_w=fc1_w, fc1_b=jnp.zeros((512,), jnp.float32),
                fc2_w=fc2_w, fc2_b=jnp.zeros((num_actions,), jnp.float32))


def prepare_params(pt_params, input_shape):
    """Pre-fold weights into kernel layout once (bf16 matmul operands, f32 biases)."""
    c_in, h, w = input_shape

    def fold_conv(wt):  # (OutC, Cin, kh, kw) -> (kh*kw*Cin, OutC)
        oc, ic, kh, kw = wt.shape
        return wt.transpose(2, 3, 1, 0).reshape(kh * kw * ic, oc).astype(jnp.bfloat16)

    p1 = 2 if h == 105 else 0
    oh = _out_sz(_out_sz(_out_sz(h, 8, 4, p1), 4, 2), 3, 1)
    ow = _out_sz(_out_sz(_out_sz(w, 8, 4, p1), 4, 2), 3, 1)

    # fc1: (512, C*OH*OW) NCHW flatten order -> (OH*OW*C, 512) NHWC flatten order.
    fc1 = pt_params["fc1_w"].reshape(512, 64, oh, ow)
    fc1 = fc1.transpose(2, 3, 1, 0).reshape(oh * ow * 64, 512)

    return dict(
        conv1_w=fold_conv(pt_params["conv1_w"]), conv1_b=pt_params["conv1_b"],
        conv2_w=fold_conv(pt_params["conv2_w"]), conv2_b=pt_params["conv2_b"],
        conv3_w=fold_conv(pt_params["conv3_w"]), conv3_b=pt_params["conv3_b"],
        fc1_w=fc1.astype(jnp.bfloat16), fc1_b=pt_params["fc1_b"],
        fc2_w=pt_params["fc2_w"].T.astype(jnp.bfloat16), fc2_b=pt_params["fc2_b"],
    )


# ----------------------------------------------------------------------------
# DQNBase.forward
# ----------------------------------------------------------------------------
def dqn_forward(params, x):
    """x: (N, C, H, W) f32 (PyTorch layout) -> q_values: (N, num_actions) f32."""
    n, c, h, w = x.shape
    x = jnp.transpose(x, (0, 2, 3, 1)).astype(jnp.bfloat16)   # NCHW -> NHWC once
    pad1 = 2 if h == 105 else 0                                # PyTorch 105-row special case
    x = conv2d_relu(x, params["conv1_w"], params["conv1_b"], kh=8, kw=8, stride=4,
                    padding=pad1)
    x = conv2d_relu(x, params["conv2_w"], params["conv2_b"], kh=4, kw=4, stride=2)
    x = conv2d_relu(x, params["conv3_w"], params["conv3_b"], kh=3, kw=3, stride=1)
    x = x.reshape(n, -1)                                       # NHWC flatten (fc1 pre-permuted)
    return fc_head(x, params["fc1_w"], params["fc1_b"],
                   params["fc2_w"], params["fc2_b"])


if __name__ == "__main__":
    # Small conv-valid shapes: batch=2, 4 stacked frames, 36x36 spatial
    # (36 -> 8 -> 3 -> 1 through the three convs, feature size = 64).
    batch, c, h, w = 2, 4, 36, 36
    num_actions = 6

    key = jax.random.PRNGKey(0)
    k_params, k_x = jax.random.split(key)

    pt_params = init_dqn_params(k_params, (c, h, w), num_actions)
    params = prepare_params(pt_params, (c, h, w))
    x = jax.random.uniform(k_x, (batch, c, h, w), jnp.float32)

    forward = jax.jit(dqn_forward)
    q = forward(params, x)
    jax.block_until_ready(q)
    assert q.shape == (batch, num_actions), q.shape
    print("KERNEL_OK")
</pallas_src>

<mosaic_0001>
module attributes {stable_mosaic.version = 11 : i64} {
  func.func @_matmul_bias_kernel(%arg0: i32, %arg1: memref<128x256xbf16, #tpu.memory_space<vmem>>, %arg2: memref<256x128xbf16, #tpu.memory_space<vmem>>, %arg3: memref<1x128xf32, #tpu.memory_space<vmem>>, %arg4: memref<128x128xbf16, #tpu.memory_space<vmem>>) attributes {dimension_semantics = [#tpu.dimension_semantics<parallel>], iteration_bounds = array<i64: 1>, scalar_prefetch = 0 : i64, scratch_operands = 0 : i64, tpu.core_type = #tpu.core_type<tc>, window_params = [{transform_indices = @transform_0, window_bounds = array<i64: 128, 256>}, {pipeline_mode = #tpu.pipeline_mode<synchronous>, transform_indices = @transform_1, window_bounds = array<i64: 256, 128>}, {pipeline_mode = #tpu.pipeline_mode<synchronous>, transform_indices = @transform_2, window_bounds = array<i64: 1, 128>}, {transform_indices = @transform_3, window_bounds = array<i64: 128, 128>}]} {
    %c0 = arith.constant 0 : index
    %c0_0 = arith.constant 0 : index
    %0 = vector.load %arg1[%c0, %c0_0] : memref<128x256xbf16, #tpu.memory_space<vmem>>, vector<128x256xbf16>
    %c0_1 = arith.constant 0 : index
    %c0_2 = arith.constant 0 : index
    %1 = vector.load %arg2[%c0_1, %c0_2] : memref<256x128xbf16, #tpu.memory_space<vmem>>, vector<256x128xbf16>
    %cst = arith.constant dense<0.000000e+00> : vector<128x128xf32>
    %2 = tpu.matmul %0, %1, %cst {dimension_numbers = #tpu.dot_dimension_numbers<[1], [0], [0], [1], [0, 0, 1, 1], [], []>} : vector<128x256xbf16>, vector<256x128xbf16>, vector<128x128xf32> -> vector<128x128xf32>
    %c0_3 = arith.constant 0 : index
    %c0_4 = arith.constant 0 : index
    %3 = vector.load %arg3[%c0_3, %c0_4] : memref<1x128xf32, #tpu.memory_space<vmem>>, vector<1x128xf32>
    %4 = vector.broadcast %3 : vector<1x128xf32> to vector<128x128xf32>
    %5 = arith.addf %2, %4 : vector<128x128xf32>
    %cst_5 = arith.constant 0.000000e+00 : f32
    %6 = vector.broadcast %cst_5 : f32 to vector<128x128xf32>
    %7 = arith.maximumf %5, %6 : vector<128x128xf32>
    %8 = arith.truncf %7 : vector<128x128xf32> to vector<128x128xbf16>
    %c0_6 = arith.constant 0 : index
    %c0_7 = arith.constant 0 : index
    %9 = vector.load %arg4[%c0_6, %c0_7] : memref<128x128xbf16, #tpu.memory_space<vmem>>, vector<128x128xbf16>
    tpu.vector_store %arg4[%c0_6, %c0_7], %8 {strides = array<i32>} : memref<128x128xbf16, #tpu.memory_space<vmem>>, vector<128x128xbf16>,
    return
  }
  func.func @transform_0(%arg0: i32) -> (i32, i32) {
    %c0_i32 = arith.constant 0 : i32
    %c0_i32_0 = arith.constant 0 : i32
    return %arg0, %c0_i32 : i32, i32
  }
  func.func @transform_1(%arg0: i32) -> (i32, i32) {
    %c0_i32 = arith.constant 0 : i32
    %c0_i32_0 = arith.constant 0 : i32
    %c0_i32_1 = arith.constant 0 : i32
    return %c0_i32, %c0_i32_0 : i32, i32
  }
  func.func @transform_2(%arg0: i32) -> (i32, i32) {
    %c0_i32 = arith.constant 0 : i32
    %c0_i32_0 = arith.constant 0 : i32
    %c0_i32_1 = arith.constant 0 : i32
    return %c0_i32, %c0_i32_0 : i32, i32
  }
  func.func @transform_3(%arg0: i32) -> (i32, i32) {
    %c0_i32 = arith.constant 0 : i32
    %c0_i32_0 = arith.constant 0 : i32
    return %arg0, %c0_i32 : i32, i32
  }
}

module attributes {stable_mosaic.version = 11 : i64} {
  func.func @_matmul_bias_kernel(%arg0: i32, %arg1: memref<32x512xbf16, #tpu.memory_space<vmem>>, %arg2: memref<512x128xbf16, #tpu.memory_space<vmem>>, %arg3: memref<1x128xf32, #tpu.memory_space<vmem>>, %arg4: memref<32x128xbf16, #tpu.memory_space<vmem>>) attributes {dimension_semantics = [#tpu.dimension_semantics<parallel>], iteration_bounds = array<i64: 1>, scalar_prefetch = 0 : i64, scratch_operands = 0 : i64, tpu.core_type = #tpu.core_type<tc>, window_params = [{transform_indices = @transform_0, window_bounds = array<i64: 32, 512>}, {pipeline_mode = #tpu.pipeline_mode<synchronous>, transform_indices = @transform_1, window_bounds = array<i64: 512, 128>}, {pipeline_mode = #tpu.pipeline_mode<synchronous>, transform_indices = @transform_2, window_bounds = array<i64: 1, 128>}, {transform_indices = @transform_3, window_bounds = array<i64: 32, 128>}]} {
    %c0 = arith.constant 0 : index
    %c0_0 = arith.constant 0 : index
    %0 = vector.load %arg1[%c0, %c0_0] : memref<32x512xbf16, #tpu.memory_space<vmem>>, vector<32x512xbf16>
    %c0_1 = arith.constant 0 : index
    %c0_2 = arith.constant 0 : index
    %1 = vector.load %arg2[%c0_1, %c0_2] : memref<512x128xbf16, #tpu.memory_space<vmem>>, vector<512x128xbf16>
    %cst = arith.constant dense<0.000000e+00> : vector<32x128xf32>
    %2 = tpu.matmul %0, %1, %cst {dimension_numbers = #tpu.dot_dimension_numbers<[1], [0], [0], [1], [0, 0, 1, 1], [], []>} : vector<32x512xbf16>, vector<512x128xbf16>, vector<32x128xf32> -> vector<32x128xf32>
    %c0_3 = arith.constant 0 : index
    %c0_4 = arith.constant 0 : index
    %3 = vector.load %arg3[%c0_3, %c0_4] : memref<1x128xf32, #tpu.memory_space<vmem>>, vector<1x128xf32>
    %4 = vector.broadcast %3 : vector<1x128xf32> to vector<32x128xf32>
    %5 = arith.addf %2, %4 : vector<32x128xf32>
    %cst_5 = arith.constant 0.000000e+00 : f32
    %6 = vector.broadcast %cst_5 : f32 to vector<32x128xf32>
    %7 = arith.maximumf %5, %6 : vector<32x128xf32>
    %8 = arith.truncf %7 : vector<32x128xf32> to vector<32x128xbf16>
    %c0_6 = arith.constant 0 : index
    %c0_7 = arith.constant 0 : index
    %9 = vector.load %arg4[%c0_6, %c0_7] : memref<32x128xbf16, #tpu.memory_space<vmem>>, vector<32x128xbf16>
    tpu.vector_store %arg4[%c0_6, %c0_7], %8 {strides = array<i32>} : memref<32x128xbf16, #tpu.memory_space<vmem>>, vector<32x128xbf16>,
    return
  }
  func.func @transform_0(%arg0: i32) -> (i32, i32) {
    %c0_i32 = arith.constant 0 : i32
    %c0_i32_0 = arith.constant 0 : i32
    return %arg0, %c0_i32 : i32, i32
  }
  func.func @transform_1(%arg0: i32) -> (i32, i32) {
    %c0_i32 = arith.constant 0 : i32
    %c0_i32_0 = arith.constant 0 : i32
    %c0_i32_1 = arith.constant 0 : i32
    return %c0_i32, %c0_i32_0 : i32, i32
  }
  func.func @transform_2(%arg0: i32) -> (i32, i32) {
    %c0_i32 = arith.constant 0 : i32
    %c0_i32_0 = arith.constant 0 : i32
    %c0_i32_1 = arith.constant 0 : i32
    return %c0_i32, %c0_i32_0 : i32, i32
  }
  func.func @transform_3(%arg0: i32) -> (i32, i32) {
    %c0_i32 = arith.constant 0 : i32
    %c0_i32_0 = arith.constant 0 : i32
    return %arg0, %c0_i32 : i32, i32
  }
}

module attributes {stable_mosaic.version = 11 : i64} {
  func.func @_matmul_bias_kernel(%arg0: i32, %arg1: memref<16x576xbf16, #tpu.memory_space<vmem>>, %arg2: memref<576x128xbf16, #tpu.memory_space<vmem>>, %arg3: memref<1x128xf32, #tpu.memory_space<vmem>>, %arg4: memref<16x128xbf16, #tpu.memory_space<vmem>>) attributes {dimension_semantics = [#tpu.dimension_semantics<parallel>], iteration_bounds = array<i64: 1>, scalar_prefetch = 0 : i64, scratch_operands = 0 : i64, tpu.core_type = #tpu.core_type<tc>, window_params = [{transform_indices = @transform_0, window_bounds = array<i64: 16, 576>}, {pipeline_mode = #tpu.pipeline_mode<synchronous>, transform_indices = @transform_1, window_bounds = array<i64: 576, 128>}, {pipeline_mode = #tpu.pipeline_mode<synchronous>, transform_indices = @transform_2, window_bounds = array<i64: 1, 128>}, {transform_indices = @transform_3, window_bounds = array<i64: 16, 128>}]} {
    %c0 = arith.constant 0 : index
    %c0_0 = arith.constant 0 : index
    %0 = vector.load %arg1[%c0, %c0_0] : memref<16x576xbf16, #tpu.memory_space<vmem>>, vector<16x576xbf16>
    %c0_1 = arith.constant 0 : index
    %c0_2 = arith.constant 0 : index
    %1 = vector.load %arg2[%c0_1, %c0_2] : memref<576x128xbf16, #tpu.memory_space<vmem>>, vector<576x128xbf16>
    %cst = arith.constant dense<0.000000e+00> : vector<16x128xf32>
    %2 = tpu.matmul %0, %1, %cst {dimension_numbers = #tpu.dot_dimension_numbers<[1], [0], [0], [1], [0, 0, 1, 1], [], []>} : vector<16x576xbf16>, vector<576x128xbf16>, vector<16x128xf32> -> vector<16x128xf32>
    %c0_3 = arith.constant 0 : index
    %c0_4 = arith.constant 0 : index
    %3 = vector.load %arg3[%c0_3, %c0_4] : memref<1x128xf32, #tpu.memory_space<vmem>>, vector<1x128xf32>
    %4 = vector.broadcast %3 : vector<1x128xf32> to vector<16x128xf32>
    %5 = arith.addf %2, %4 : vector<16x128xf32>
    %cst_5 = arith.constant 0.000000e+00 : f32
    %6 = vector.broadcast %cst_5 : f32 to vector<16x128xf32>
    %7 = arith.maximumf %5, %6 : vector<16x128xf32>
    %8 = arith.truncf %7 : vector<16x128xf32> to vector<16x128xbf16>
    %c0_6 = arith.constant 0 : index
    %c0_7 = arith.constant 0 : index
    %9 = vector.load %arg4[%c0_6, %c0_7] : memref<16x128xbf16, #tpu.memory_space<vmem>>, vector<16x128xbf16>
    tpu.vector_store %arg4[%c0_6, %c0_7], %8 {strides = array<i32>} : memref<16x128xbf16, #tpu.memory_space<vmem>>, vector<16x128xbf16>,
    return
  }
  func.func @transform_0(%arg0: i32) -> (i32, i32) {
    %c0_i32 = arith.constant 0 : i32
    %c0_i32_0 = arith.constant 0 : i32
    return %arg0, %c0_i32 : i32, i32
  }
  func.func @transform_1(%arg0: i32) -> (i32, i32) {
    %c0_i32 = arith.constant 0 : i32
    %c0_i32_0 = arith.constant 0 : i32
    %c0_i32_1 = arith.constant 0 : i32
    return %c0_i32, %c0_i32_0 : i32, i32
  }
  func.func @transform_2(%arg0: i32) -> (i32, i32) {
    %c0_i32 = arith.constant 0 : i32
    %c0_i32_0 = arith.constant 0 : i32
    %c0_i32_1 = arith.constant 0 : i32
    return %c0_i32, %c0_i32_0 : i32, i32
  }
  func.func @transform_3(%arg0: i32) -> (i32, i32) {
    %c0_i32 = arith.constant 0 : i32
    %c0_i32_0 = arith.constant 0 : i32
    return %arg0, %c0_i32 : i32, i32
  }
}

module attributes {stable_mosaic.version = 11 : i64} {
  func.func @_fc_head_kernel(%arg0: i32, %arg1: memref<16x64xbf16, #tpu.memory_space<vmem>>, %arg2: memref<64x512xbf16, #tpu.memory_space<vmem>>, %arg3: memref<1x512xf32, #tpu.memory_space<vmem>>, %arg4: memref<512x128xbf16, #tpu.memory_space<vmem>>, %arg5: memref<1x128xf32, #tpu.memory_space<vmem>>, %arg6: memref<16x128xf32, #tpu.memory_space<vmem>>) attributes {dimension_semantics = [#tpu.dimension_semantics<parallel>], iteration_bounds = array<i64: 1>, scalar_prefetch = 0 : i64, scratch_operands = 0 : i64, tpu.core_type = #tpu.core_type<tc>, window_params = [{transform_indices = @transform_0, window_bounds = array<i64: 16, 64>}, {pipeline_mode = #tpu.pipeline_mode<synchronous>, transform_indices = @transform_1, window_bounds = array<i64: 64, 512>}, {pipeline_mode = #tpu.pipeline_mode<synchronous>, transform_indices = @transform_2, window_bounds = array<i64: 1, 512>}, {pipeline_mode = #tpu.pipeline_mode<synchronous>, transform_indices = @transform_3, window_bounds = array<i64: 512, 128>}, {pipeline_mode = #tpu.pipeline_mode<synchronous>, transform_indices = @transform_4, window_bounds = array<i64: 1, 128>}, {transform_indices = @transform_5, window_bounds = array<i64: 16, 128>}]} {
    %c0 = arith.constant 0 : index
    %c0_0 = arith.constant 0 : index
    %0 = vector.load %arg1[%c0, %c0_0] : memref<16x64xbf16, #tpu.memory_space<vmem>>, vector<16x64xbf16>
    %c0_1 = arith.constant 0 : index
    %c0_2 = arith.constant 0 : index
    %1 = vector.load %arg2[%c0_1, %c0_2] : memref<64x512xbf16, #tpu.memory_space<vmem>>, vector<64x512xbf16>
    %cst = arith.constant dense<0.000000e+00> : vector<16x512xf32>
    %2 = tpu.matmul %0, %1, %cst {dimension_numbers = #tpu.dot_dimension_numbers<[1], [0], [0], [1], [0, 0, 1, 1], [], []>} : vector<16x64xbf16>, vector<64x512xbf16>, vector<16x512xf32> -> vector<16x512xf32>
    %c0_3 = arith.constant 0 : index
    %c0_4 = arith.constant 0 : index
    %3 = vector.load %arg3[%c0_3, %c0_4] : memref<1x512xf32, #tpu.memory_space<vmem>>, vector<1x512xf32>
    %4 = vector.broadcast %3 : vector<1x512xf32> to vector<16x512xf32>
    %5 = arith.addf %2, %4 : vector<16x512xf32>
    %cst_5 = arith.constant 0.000000e+00 : f32
    %6 = vector.broadcast %cst_5 : f32 to vector<16x512xf32>
    %7 = arith.maximumf %5, %6 : vector<16x512xf32>
    %8 = arith.truncf %7 : vector<16x512xf32> to vector<16x512xbf16>
    %c0_6 = arith.constant 0 : index
    %c0_7 = arith.constant 0 : index
    %9 = vector.load %arg4[%c0_6, %c0_7] : memref<512x128xbf16, #tpu.memory_space<vmem>>, vector<512x128xbf16>
    %cst_8 = arith.constant dense<0.000000e+00> : vector<16x128xf32>
    %10 = tpu.matmul %8, %9, %cst_8 {dimension_numbers = #tpu.dot_dimension_numbers<[1], [0], [0], [1], [0, 0, 1, 1], [], []>} : vector<16x512xbf16>, vector<512x128xbf16>, vector<16x128xf32> -> vector<16x128xf32>
    %c0_9 = arith.constant 0 : index
    %c0_10 = arith.constant 0 : index
    %11 = vector.load %arg5[%c0_9, %c0_10] : memref<1x128xf32, #tpu.memory_space<vmem>>, vector<1x128xf32>
    %12 = vector.broadcast %11 : vector<1x128xf32> to vector<16x128xf32>
    %13 = arith.addf %10, %12 : vector<16x128xf32>
    %c0_11 = arith.constant 0 : index
    %c0_12 = arith.constant 0 : index
    %14 = vector.load %arg6[%c0_11, %c0_12] : memref<16x128xf32, #tpu.memory_space<vmem>>, vector<16x128xf32>
    tpu.vector_store %arg6[%c0_11, %c0_12], %13 {strides = array<i32>} : memref<16x128xf32, #tpu.memory_space<vmem>>, vector<16x128xf32>,
    return
  }
  func.func @transform_0(%arg0: i32) -> (i32, i32) {
    %c0_i32 = arith.constant 0 : i32
    %c0_i32_0 = arith.constant 0 : i32
    return %arg0, %c0_i32 : i32, i32
  }
  func.func @transform_1(%arg0: i32) -> (i32, i32) {
    %c0_i32 = arith.constant 0 : i32
    %c0_i32_0 = arith.constant 0 : i32
    %c0_i32_1 = arith.constant 0 : i32
    return %c0_i32, %c0_i32_0 : i32, i32
  }
  func.func @transform_2(%arg0: i32) -> (i32, i32) {
    %c0_i32 = arith.constant 0 : i32
    %c0_i32_0 = arith.constant 0 : i32
    %c0_i32_1 = arith.constant 0 : i32
    return %c0_i32, %c0_i32_0 : i32, i32
  }
  func.func @transform_3(%arg0: i32) -> (i32, i32) {
    %c0_i32 = arith.constant 0 : i32
    %c0_i32_0 = arith.constant 0 : i32
    %c0_i32_1 = arith.constant 0 : i32
    return %c0_i32, %c0_i32_0 : i32, i32
  }
  func.func @transform_4(%arg0: i32) -> (i32, i32) {
    %c0_i32 = arith.constant 0 : i32
    %c0_i32_0 = arith.constant 0 : i32
    %c0_i32_1 = arith.constant 0 : i32
    return %c0_i32, %c0_i32_0 : i32, i32
  }
  func.func @transform_5(%arg0: i32) -> (i32, i32) {
    %c0_i32 = arith.constant 0 : i32
    %c0_i32_0 = arith.constant 0 : i32
    return %arg0, %c0_i32 : i32, i32
  }
}

</mosaic_0001>

<bundles_post_ra>
// kernel: dqn_forward.4
= control target key start
LH: loop header
LB: loop body
LE: loop exit
PB: predicated region body
PF: predicated region fallthrough
CT: control target
= control target key end

     0   :  { %s836_s1 = inlined_call_operand.vmem [shape: bf16[256,128], index: 1, kind: input, shape index: {}]   ;;  %s837_s0 = inlined_call_operand.vmem [shape: bf16[128,256], index: 0, kind: input, shape index: {}]   ;;  %s838_s2 = inlined_call_operand.vmem [shape: f32[1,128], index: 2, kind: input, shape index: {}]   ;;  %s839_s3 = inlined_call_operand.vmem [shape: bf16[128,128], index: 3, kind: output, shape index: {}]  }
   0x1   :  { %v635_v0 = vld [vmem:[%s836_s1 + $0x78] sm:$0xff]   ;;  %v637_v2 = vld [vmem:[%s836_s1 + $0x70] sm:$0xff]   ;;  %v639_v4 = vld [vmem:[%s836_s1 + $0x68] sm:$0xff]  }
   0x2   :  { %v636_v1 = vld [vmem:[%s836_s1 + $0x38] sm:$0xff]   ;;  %555 = vmatprep.subr.bf16.mxu0 %v635_v0  ;;  %619 = vmatprep.subr.bf16.mxu1 %v635_v0  ;;  %v638_v3 = vld [vmem:[%s836_s1 + $0x30] sm:$0xff]   ;;  %v640_v5 = vld [vmem:[%s836_s1 + $0x28] sm:$0xff]  }
   0x3   :  { %556 = vmatpush3.bf16.msra.mxu0 %v636_v1  ;;  %627 = vmatpush3.bf16.msra.mxu1 %v636_v1  ;;  %v641_v6 = vld [vmem:[%s836_s1 + $0x60] sm:$0xff]   ;;  %v643_v8 = vld [vmem:[%s836_s1 + $0x58] sm:$0xff]   ;;  %v645_v10 = vld [vmem:[%s836_s1 + $0x50] sm:$0xff]  }
   0x4   :  { %557 = vmatprep.subr.bf16.mxu0 %v637_v2  ;;  %620 = vmatprep.subr.bf16.mxu1 %v637_v2  ;;  %v642_v7 = vld [vmem:[%s836_s1 + $0x20] sm:$0xff]   ;;  %v644_v9 = vld [vmem:[%s836_s1 + $0x18] sm:$0xff]   ;;  %v646_v13 = vld [vmem:[%s836_s1 + $0x10] sm:$0xff]  }
   0x5   :  { %v653_v11 = vld [vmem:[%s837_s0 + $0x4] ss:$8 sps:$4 sm:$0xff]   ;;  %v651_v18 = vld [vmem:[%s837_s0] ss:$8 sps:$4 sm:$0xff]   ;;  %v657_v20 = vld [vmem:[%s837_s0 + $0x14] ss:$8 sps:$4 sm:$0xff]  }
   0x6   :  { %v656_v12 = vld [vmem:[%s837_s0 + $0x44] ss:$8 sps:$4 sm:$0xff]   ;;  %278 = vmatprep.mubr.bf16.mxu0 %v653_v11  ;;  %v654_v19 = vld [vmem:[%s837_s0 + $0x40] ss:$8 sps:$4 sm:$0xff]   ;;  %v659_v21 = vld [vmem:[%s837_s0 + $0x54] ss:$8 sps:$4 sm:$0xff]  }
   0x7   :  { %558 = vmatpush3.bf16.msra.mxu0 %v638_v3  ;;  %628 = vmatpush3.bf16.msra.mxu1 %v638_v3  ;;  %v647_v14 = vld [vmem:[%s836_s1 + $0x48] sm:$0xff]   ;;  %v649_v16 = vld [vmem:[%s836_s1 + $0x40] sm:$0xff]   ;;  %v661_v22 = vld [vmem:[%s837_s0 + $0x10] ss:$8 sps:$4 sm:$0xff]  }
   0x8   :  { %559 = vmatprep.subr.bf16.mxu0 %v639_v4  ;;  %621 = vmatprep.subr.bf16.mxu1 %v639_v4  ;;  %v648_v15 = vld [vmem:[%s836_s1 + $0x8] sm:$0xff]   ;;  %v650_v17 = vld [vmem:[%s836_s1] sm:$0xff]   ;;  %v662_v23 = vld [vmem:[%s837_s0 + $0x50] ss:$8 sps:$4 sm:$0xff]  }
   0x9   :  { %310 = vmatprep.mubr.bf16.mxu1 %v656_v12  ;;  %v663_v24 = vld [vmem:[%s837_s0 + $0x24] ss:$8 sps:$4 sm:$0xff]   ;;  %v667_v26 = vld [vmem:[%s837_s0 + $0x20] ss:$8 sps:$4 sm:$0xff]   ;;  %v669_v28 = vld [vmem:[%s837_s0 + $0x34] ss:$8 sps:$4 sm:$0xff]  }
   0xa   :  { %v665_v25 = vld [vmem:[%s837_s0 + $0x64] ss:$8 sps:$4 sm:$0xff]   ;;  %v668_v27 = vld [vmem:[%s837_s0 + $0x60] ss:$8 sps:$4 sm:$0xff]   ;;  %v671_v29 = vld [vmem:[%s837_s0 + $0x74] ss:$8 sps:$4 sm:$0xff]  }
   0xb   :  { %560 = vmatpush3.bf16.msra.mxu0 %v640_v5  ;;  %629 = vmatpush3.bf16.msra.mxu1 %v640_v5  ;;  %v673_v30 = vld [vmem:[%s837_s0 + $0x30] ss:$8 sps:$4 sm:$0xff]   ;;  %v794_v36 = vld [vmem:[%s838_s2] ss:$0 sm:$0xff] }
   0xc   :  { %561 = vmatprep.subr.bf16.mxu0 %v641_v6  ;;  %622 = vmatprep.subr.bf16.mxu1 %v641_v6  ;;  %v674_v31 = vld [vmem:[%s837_s0 + $0x70] ss:$8 sps:$4 sm:$0xff]  }
   0xf   :  { %562 = vmatpush3.bf16.msra.mxu0 %v642_v7  ;;  %630 = vmatpush3.bf16.msra.mxu1 %v642_v7 }
  0x10   :  { %563 = vmatprep.subr.bf16.mxu0 %v643_v8  ;;  %623 = vmatprep.subr.bf16.mxu1 %v643_v8 }
  0x13   :  { %564 = vmatpush3.bf16.msra.mxu0 %v644_v9  ;;  %631 = vmatpush3.bf16.msra.mxu1 %v644_v9 }
  0x14   :  { %565 = vmatprep.subr.bf16.mxu0 %v645_v10  ;;  %624 = vmatprep.subr.bf16.mxu1 %v645_v10 }
  0x17   :  { %566 = vmatpush3.bf16.msra.mxu0 %v646_v13  ;;  %632 = vmatpush3.bf16.msra.mxu1 %v646_v13 }
  0x18   :  { %567 = vmatprep.subr.bf16.mxu0 %v647_v14  ;;  %625 = vmatprep.subr.bf16.mxu1 %v647_v14 }
  0x1b   :  { %568 = vmatpush3.bf16.msra.mxu0 %v648_v15  ;;  %633 = vmatpush3.bf16.msra.mxu1 %v648_v15 }
  0x1c   :  { %569 = vmatprep.subr.bf16.mxu0 %v649_v16  ;;  %626 = vmatprep.subr.bf16.mxu1 %v649_v16 }
  0x1f   :  { %570 = vmatpush3.bf16.msra.mxu0 %v650_v17  ;;  %634 = vmatpush3.bf16.msra.mxu1 %v650_v17 }
  0x22   :  { %279 = vmatmul.mubr.bf16.vlgmr.msra.gmra.mxu0 %v651_v18  ;;  %311 = vmatmul.mubr.bf16.vlgmr.msra.gmra.mxu1 %v654_v19 }
  0x23   :  { %286 = vmatprep.mubr.bf16.mxu0 %v657_v20  ;;  %318 = vmatprep.mubr.bf16.mxu1 %v659_v21 }
  0x2a   :  { %287 = vmatmul.mubr.bf16.gmra.mxu0 %v661_v22  ;;  %319 = vmatmul.mubr.bf16.gmra.mxu1 %v662_v23 }
  0x2b   :  { %294 = vmatprep.mubr.bf16.mxu0 %v663_v24  ;;  %326 = vmatprep.mubr.bf16.mxu1 %v665_v25 }
  0x32   :  { %295 = vmatmul.mubr.bf16.gmra.mxu0 %v667_v26  ;;  %327 = vmatmul.mubr.bf16.gmra.mxu1 %v668_v27 }
  0x33   :  { %302 = vmatprep.mubr.bf16.mxu0 %v669_v28  ;;  %334 = vmatprep.mubr.bf16.mxu1 %v671_v29 }
  0x3a   :  { %303 = vmatmul.mubr.bf16.gmra.mxu0 %v673_v30  ;;  %335 = vmatmul.mubr.bf16.gmra.mxu1 %v674_v31 }
  0xe2   :  { %v571_v32 = vpop.f32.mrf.mxu0  ;;  %v595_v33 = vpop.f32.mrf.mxu1 }
  0xe4   :  { %v572_v34 = vpop.f32.mrf.mxu0  ;;  %v596_v35 = vpop.f32.mrf.mxu1 }
  0xe5   :  { %v573_v37 = vadd.f32 %v572_v34, %v571_v32  ;;  %v597_v38 = vadd.f32 %v596_v35, %v595_v33 }
  0xe6   :  { %v574_v39 = vpop.f32.mrf.mxu0  ;;  %v598_v40 = vpop.f32.mrf.mxu1 }
  0xe7   :  { %v281_v41 = vadd.f32 %v573_v37, %v794_v36  ;;  %v313_v42 = vadd.f32 %v597_v38, %v794_v36 }
  0xe8   :  { %v575_v43 = vpop.f32.mrf.mxu0  ;;  %v599_v44 = vpop.f32.mrf.mxu1 }
  0xe9   :  { %v576_v45 = vadd.f32 %v575_v43, %v574_v39  ;;  %v600_v46 = vadd.f32 %v599_v44, %v598_v40  ;;  %v343_v51 = vmax.f32 %v281_v41, 0.0  ;;  %v351_v52 = vmax.f32 %v313_v42, 0.0 }
  0xea   :  { %v577_v47 = vpop.f32.mrf.mxu0  ;;  %v601_v48 = vpop.f32.mrf.mxu1 }
  0xeb   :  { %v284_v49 = vadd.f32 %v576_v45, %v794_v36  ;;  %v316_v50 = vadd.f32 %v600_v46, %v794_v36 }
  0xec   :  { %v578_v53 = vpop.f32.mrf.mxu0  ;;  %v602_v54 = vpop.f32.mrf.mxu1 }
  0xed   :  { %v344_v55 = vmax.f32 %v284_v49, 0.0  ;;  %v352_v56 = vmax.f32 %v316_v50, 0.0  ;;  %v579_v57 = vadd.f32 %v578_v53, %v577_v47  ;;  %v603_v58 = vadd.f32 %v602_v54, %v601_v48 }
  0xee   :  { %v580_v59 = vpop.f32.mrf.mxu0  ;;  %v604_v60 = vpop.f32.mrf.mxu1 }
  0xef   :  { %v511_v61 = vpack.c.bf16 %v344_v55, %v343_v51  ;;  %v531_v62 = vpack.c.bf16 %v352_v56, %v351_v52  ;;  %v289_v63 = vadd.f32 %v579_v57, %v794_v36  ;;  %v321_v0 = vadd.f32 %v603_v58, %v794_v36 }
  0xf0   :  { %v581_v1 = vpop.f32.mrf.mxu0  ;;  %v605_v2 = vpop.f32.mrf.mxu1 }
  0xf1   :  { %512 = vst [vmem:[%s839_s3] sm:$0xff] %v511_v61   ;;  %551 = vst [vmem:[%s839_s3 + $0x20] sm:$0xff] %v531_v62   ;;  %v582_v3 = vadd.f32 %v581_v1, %v580_v59  ;;  %v606_v4 = vadd.f32 %v605_v2, %v604_v60  ;;  %v345_v9 = vmax.f32 %v289_v63, 0.0  ;;  %v353_v10 = vmax.f32 %v321_v0, 0.0 }
  0xf2   :  { %v583_v5 = vpop.f32.mrf.mxu0  ;;  %v607_v6 = vpop.f32.mrf.mxu1 }
  0xf3   :  { %v292_v7 = vadd.f32 %v582_v3, %v794_v36  ;;  %v324_v8 = vadd.f32 %v606_v4, %v794_v36 }
  0xf4   :  { %v584_v11 = vpop.f32.mrf.mxu0  ;;  %v608_v12 = vpop.f32.mrf.mxu1 }
  0xf5   :  { %v346_v13 = vmax.f32 %v292_v7, 0.0  ;;  %v354_v14 = vmax.f32 %v324_v8, 0.0  ;;  %v585_v15 = vadd.f32 %v584_v11, %v583_v5  ;;  %v609_v16 = vadd.f32 %v608_v12, %v607_v6 }
  0xf6   :  { %v586_v17 = vpop.f32.mrf.mxu0  ;;  %v610_v18 = vpop.f32.mrf.mxu1 }
  0xf7   :  { %v516_v19 = vpack.c.bf16 %v346_v13, %v345_v9  ;;  %v536_v20 = vpack.c.bf16 %v354_v14, %v353_v10  ;;  %v297_v21 = vadd.f32 %v585_v15, %v794_v36  ;;  %v329_v22 = vadd.f32 %v609_v16, %v794_v36 }
  0xf8   :  { %v587_v23 = vpop.f32.mrf.mxu0  ;;  %v611_v24 = vpop.f32.mrf.mxu1 }
  0xf9   :  { %548 = vst [vmem:[%s839_s3 + $0x8] sm:$0xff] %v516_v19   ;;  %552 = vst [vmem:[%s839_s3 + $0x28] sm:$0xff] %v536_v20   ;;  %v588_v25 = vadd.f32 %v587_v23, %v586_v17  ;;  %v612_v26 = vadd.f32 %v611_v24, %v610_v18  ;;  %v347_v31 = vmax.f32 %v297_v21, 0.0  ;;  %v355_v32 = vmax.f32 %v329_v22, 0.0 }
  0xfa   :  { %v589_v27 = vpop.f32.mrf.mxu0  ;;  %v613_v28 = vpop.f32.mrf.mxu1 }
  0xfb   :  { %v300_v29 = vadd.f32 %v588_v25, %v794_v36  ;;  %v332_v30 = vadd.f32 %v612_v26, %v794_v36 }
  0xfc   :  { %v590_v33 = vpop.f32.mrf.mxu0  ;;  %v614_v34 = vpop.f32.mrf.mxu1 }
  0xfd   :  { %v348_v35 = vmax.f32 %v300_v29, 0.0  ;;  %v356_v37 = vmax.f32 %v332_v30, 0.0  ;;  %v591_v38 = vadd.f32 %v590_v33, %v589_v27  ;;  %v615_v39 = vadd.f32 %v614_v34, %v613_v28 }
  0xfe   :  { %v592_v40 = vpop.f32.mrf.mxu0  ;;  %v616_v41 = vpop.f32.mrf.mxu1 }
  0xff   :  { %v521_v42 = vpack.c.bf16 %v348_v35, %v347_v31  ;;  %v541_v43 = vpack.c.bf16 %v356_v37, %v355_v32  ;;  %v305_v46 = vadd.f32 %v591_v38, %v794_v36  ;;  %v337_v47 = vadd.f32 %v615_v39, %v794_v36 }
 0x100   :  { %v593_v44 = vpop.f32.mrf.mxu0  ;;  %v617_v45 = vpop.f32.mrf.mxu1 }
 0x101   :  { %549 = vst [vmem:[%s839_s3 + $0x10] sm:$0xff] %v521_v42   ;;  %553 = vst [vmem:[%s839_s3 + $0x30] sm:$0xff] %v541_v43   ;;  %v594_v48 = vadd.f32 %v593_v44, %v592_v40  ;;  %v618_v49 = vadd.f32 %v617_v45, %v616_v41  ;;  %v349_v52 = vmax.f32 %v305_v46, 0.0  ;;  %v357_v53 = vmax.f32 %v337_v47, 0.0 }
 0x103   :  { %v308_v50 = vadd.f32 %v594_v48, %v794_v36  ;;  %v340_v51 = vadd.f32 %v618_v49, %v794_v36 }
 0x105   :  { %v350_v54 = vmax.f32 %v308_v50, 0.0  ;;  %v358_v55 = vmax.f32 %v340_v51, 0.0 }
 0x107   :  { %v526_v56 = vpack.c.bf16 %v350_v54, %v349_v52  ;;  %v546_v57 = vpack.c.bf16 %v358_v55, %v357_v53 }
 0x109   :  { %550 = vst [vmem:[%s839_s3 + $0x18] sm:$0xff] %v526_v56   ;;  %554 = vst [vmem:[%s839_s3 + $0x38] sm:$0xff] %v546_v57  }

// kernel: dqn_forward.5
= control target key start
LH: loop header
LB: loop body
LE: loop exit
PB: predicated region body
PF: predicated region fallthrough
CT: control target
= control target key end

     0   :  { %s761_s1 = inlined_call_operand.vmem [shape: bf16[512,128], index: 1, kind: input, shape index: {}]   ;;  %s762_s0 = inlined_call_operand.vmem [shape: bf16[32,512], index: 0, kind: input, shape index: {}]   ;;  %s763_s2 = inlined_call_operand.vmem [shape: f32[1,128], index: 2, kind: input, shape index: {}]   ;;  %s764_s3 = inlined_call_operand.vmem [shape: bf16[32,128], index: 3, kind: output, shape index: {}]  }
   0x1   :  { %v568_v0 = vld [vmem:[%s761_s1 + $0x78] sm:$0xff]   ;;  %v572_v4 = vld [vmem:[%s761_s1 + $0x70] sm:$0xff]   ;;  %v576_v8 = vld [vmem:[%s761_s1 + $0x68] sm:$0xff]  }
   0x2   :  { %v569_v1 = vld [vmem:[%s761_s1 + $0xf8] sm:$0xff]   ;;  %512 = vmatprep.subr.bf16.mxu0 %v568_v0  ;;  %v573_v5 = vld [vmem:[%s761_s1 + $0xf0] sm:$0xff]   ;;  %v577_v9 = vld [vmem:[%s761_s1 + $0xe8] sm:$0xff]  }
   0x3   :  { %v570_v2 = vld [vmem:[%s761_s1 + $0x38] sm:$0xff]   ;;  %540 = vmatprep.subr.bf16.mxu1 %v569_v1  ;;  %v574_v6 = vld [vmem:[%s761_s1 + $0x30] sm:$0xff]   ;;  %v578_v10 = vld [vmem:[%s761_s1 + $0x28] sm:$0xff]  }
   0x4   :  { %v571_v3 = vld [vmem:[%s761_s1 + $0xb8] sm:$0xff]   ;;  %513 = vmatpush3.bf16.msra.mxu0 %v570_v2  ;;  %v575_v7 = vld [vmem:[%s761_s1 + $0xb0] sm:$0xff]   ;;  %v579_v11 = vld [vmem:[%s761_s1 + $0xa8] sm:$0xff]  }
   0x5   :  { %541 = vmatpush3.bf16.msra.mxu1 %v571_v3  ;;  %514 = vmatprep.subr.bf16.mxu0 %v572_v4  ;;  %v580_v12 = vld [vmem:[%s761_s1 + $0x60] sm:$0xff]   ;;  %v584_v16 = vld [vmem:[%s761_s1 + $0x58] sm:$0xff]   ;;  %v588_v20 = vld [vmem:[%s761_s1 + $0x50] sm:$0xff]  }
   0x6   :  { %542 = vmatprep.subr.bf16.mxu1 %v573_v5  ;;  %v581_v13 = vld [vmem:[%s761_s1 + $0xe0] sm:$0xff]   ;;  %v585_v17 = vld [vmem:[%s761_s1 + $0xd8] sm:$0xff]   ;;  %v589_v21 = vld [vmem:[%s761_s1 + $0xd0] sm:$0xff]  }
   0x7   :  { %v582_v14 = vld [vmem:[%s761_s1 + $0x20] sm:$0xff]   ;;  %v586_v18 = vld [vmem:[%s761_s1 + $0x18] sm:$0xff]   ;;  %v590_v22 = vld [vmem:[%s761_s1 + $0x10] sm:$0xff]  }
   0x8   :  { %515 = vmatpush3.bf16.msra.mxu0 %v574_v6  ;;  %v583_v15 = vld [vmem:[%s761_s1 + $0xa0] sm:$0xff]   ;;  %v587_v19 = vld [vmem:[%s761_s1 + $0x98] sm:$0xff]   ;;  %v591_v23 = vld [vmem:[%s761_s1 + $0x90] sm:$0xff]  }
   0x9   :  { %543 = vmatpush3.bf16.msra.mxu1 %v575_v7  ;;  %516 = vmatprep.subr.bf16.mxu0 %v576_v8  ;;  %v592_v24 = vld [vmem:[%s761_s1 + $0x48] sm:$0xff]   ;;  %v596_v28 = vld [vmem:[%s761_s1 + $0x40] sm:$0xff]  }
   0xa   :  { %544 = vmatprep.subr.bf16.mxu1 %v577_v9  ;;  %v593_v25 = vld [vmem:[%s761_s1 + $0xc8] sm:$0xff]   ;;  %v597_v29 = vld [vmem:[%s761_s1 + $0xc0] sm:$0xff]  }
   0xb   :  { %v594_v26 = vld [vmem:[%s761_s1 + $0x8] sm:$0xff]   ;;  %v598_v30 = vld [vmem:[%s761_s1] sm:$0xff]  }
   0xc   :  { %517 = vmatpush3.bf16.msra.mxu0 %v578_v10  ;;  %v595_v27 = vld [vmem:[%s761_s1 + $0x88] sm:$0xff]   ;;  %v599_v31 = vld [vmem:[%s761_s1 + $0x80] sm:$0xff]  }
   0xd   :  { %545 = vmatpush3.bf16.msra.mxu1 %v579_v11  ;;  %518 = vmatprep.subr.bf16.mxu0 %v580_v12  ;;  %v600_v32 = vld [vmem:[%s762_s0] ss:$16 sps:$4 sm:$0xff]   ;;  %v602_v33 = vld [vmem:[%s762_s0 + $0x4] ss:$16 sps:$4 sm:$0xff]   ;;  %v603_v34 = vld [vmem:[%s762_s0 + $0x8] ss:$16 sps:$4 sm:$0xff]  }
   0xe   :  { %546 = vmatprep.subr.bf16.mxu1 %v581_v13  ;;  %v605_v35 = vld [vmem:[%s762_s0 + $0xc] ss:$16 sps:$4 sm:$0xff]   ;;  %358 = vmatprep.mubr.bf16.mxu0 %v602_v33  ;;  %v606_v36 = vld [vmem:[%s762_s0 + $0x24] ss:$16 sps:$4 sm:$0xff]   ;;  %v610_v38 = vld [vmem:[%s762_s0 + $0x20] ss:$16 sps:$4 sm:$0xff]  }
   0xf   :  { %407 = vmatprep.mubr.bf16.mxu1 %v605_v35  ;;  %v608_v37 = vld [vmem:[%s762_s0 + $0x2c] ss:$16 sps:$4 sm:$0xff]   ;;  %v611_v39 = vld [vmem:[%s762_s0 + $0x28] ss:$16 sps:$4 sm:$0xff]   ;;  %v452_v42 = vld [vmem:[%s763_s2] ss:$0 sm:$0xff] }
  0x10   :  { %519 = vmatpush3.bf16.msra.mxu0 %v582_v14 }
  0x11   :  { %547 = vmatpush3.bf16.msra.mxu1 %v583_v15  ;;  %520 = vmatprep.subr.bf16.mxu0 %v584_v16 }
  0x12   :  { %548 = vmatprep.subr.bf16.mxu1 %v585_v17 }
  0x14   :  { %521 = vmatpush3.bf16.msra.mxu0 %v586_v18 }
  0x15   :  { %549 = vmatpush3.bf16.msra.mxu1 %v587_v19  ;;  %522 = vmatprep.subr.bf16.mxu0 %v588_v20 }
  0x16   :  { %550 = vmatprep.subr.bf16.mxu1 %v589_v21 }
  0x18   :  { %523 = vmatpush3.bf16.msra.mxu0 %v590_v22 }
  0x19   :  { %551 = vmatpush3.bf16.msra.mxu1 %v591_v23  ;;  %524 = vmatprep.subr.bf16.mxu0 %v592_v24 }
  0x1a   :  { %552 = vmatprep.subr.bf16.mxu1 %v593_v25 }
  0x1c   :  { %525 = vmatpush3.bf16.msra.mxu0 %v594_v26 }
  0x1d   :  { %553 = vmatpush3.bf16.msra.mxu1 %v595_v27  ;;  %526 = vmatprep.subr.bf16.mxu0 %v596_v28 }
  0x1e   :  { %554 = vmatprep.subr.bf16.mxu1 %v597_v29 }
  0x20   :  { %527 = vmatpush3.bf16.msra.mxu0 %v598_v30 }
  0x21   :  { %555 = vmatpush3.bf16.msra.mxu1 %v599_v31 }
  0x23   :  { %359 = vmatmul.mubr.bf16.vlgmr.msra.gmra.mxu0 %v600_v32 }
  0x24   :  { %408 = vmatmul.mubr.bf16.vlgmr.msra.gmra.mxu1 %v603_v34  ;;  %366 = vmatprep.mubr.bf16.mxu0 %v606_v36 }
  0x25   :  { %415 = vmatprep.mubr.bf16.mxu1 %v608_v37 }
  0x2b   :  { %367 = vmatmul.mubr.bf16.gmra.mxu0 %v610_v38 }
  0x2c   :  { %416 = vmatmul.mubr.bf16.gmra.mxu1 %v611_v39 }
  0xe3   :  { %v528_v40 = vpop.f32.mrf.mxu0 }
  0xe4   :  { %v556_v41 = vpop.f32.mrf.mxu1 }
  0xe5   :  { %v529_v43 = vpop.f32.mrf.mxu0 }
  0xe6   :  { %v530_v44 = vadd.f32 %v529_v43, %v528_v40  ;;  %v557_v45 = vpop.f32.mrf.mxu1 }
  0xe7   :  { %v531_v46 = vpop.f32.mrf.mxu0  ;;  %v558_v50 = vadd.f32 %v557_v45, %v556_v41 }
  0xe8   :  { %v361_v47 = vadd.f32 %v530_v44, %v452_v42  ;;  %v559_v48 = vpop.f32.mrf.mxu1 }
  0xe9   :  { %v532_v49 = vpop.f32.mrf.mxu0 }
  0xea   :  { %v533_v51 = vadd.f32 %v532_v49, %v531_v46  ;;  %v560_v52 = vpop.f32.mrf.mxu1  ;;  %v410_v54 = vadd.f32 %v558_v50, %v361_v47 }
  0xeb   :  { %v534_v53 = vpop.f32.mrf.mxu0  ;;  %v561_v56 = vadd.f32 %v560_v52, %v559_v48 }
  0xec   :  { %v364_v55 = vadd.f32 %v533_v51, %v452_v42  ;;  %v562_v57 = vpop.f32.mrf.mxu1  ;;  %v424_v63 = vmax.f32 %v410_v54, 0.0 }
  0xed   :  { %v535_v58 = vpop.f32.mrf.mxu0 }
  0xee   :  { %v413_v59 = vadd.f32 %v561_v56, %v364_v55  ;;  %v536_v60 = vadd.f32 %v535_v58, %v534_v53  ;;  %v563_v61 = vpop.f32.mrf.mxu1 }
  0xef   :  { %v537_v62 = vpop.f32.mrf.mxu0  ;;  %v564_v5 = vadd.f32 %v563_v61, %v562_v57 }
  0xf0   :  { %v425_v0 = vmax.f32 %v413_v59, 0.0  ;;  %v369_v1 = vadd.f32 %v536_v60, %v452_v42  ;;  %v565_v2 = vpop.f32.mrf.mxu1 }
  0xf1   :  { %v538_v3 = vpop.f32.mrf.mxu0 }
  0xf2   :  { %v504_v4 = vpack.c.bf16 %v425_v0, %v424_v63  ;;  %v539_v6 = vadd.f32 %v538_v3, %v537_v62  ;;  %v566_v7 = vpop.f32.mrf.mxu1  ;;  %v418_v8 = vadd.f32 %v564_v5, %v369_v1 }
  0xf3   :  { %v567_v10 = vadd.f32 %v566_v7, %v565_v2 }
  0xf4   :  { %505 = vst [vmem:[%s764_s3] sm:$0xff] %v504_v4   ;;  %v372_v9 = vadd.f32 %v539_v6, %v452_v42  ;;  %v426_v12 = vmax.f32 %v418_v8, 0.0 }
  0xf6   :  { %v421_v11 = vadd.f32 %v567_v10, %v372_v9 }
  0xf8   :  { %v427_v13 = vmax.f32 %v421_v11, 0.0 }
  0xfa   :  { %v509_v14 = vpack.c.bf16 %v427_v13, %v426_v12 }
  0xfc   :  { %511 = vst [vmem:[%s764_s3 + $0x8] sm:$0xff] %v509_v14  }

// kernel: dqn_forward.6
= control target key start
LH: loop header
LB: loop body
LE: loop exit
PB: predicated region body
PF: predicated region fallthrough
CT: control target
= control target key end

     0   :  { %v642_v33 = vmov 0.0   ;;  %vm643_vm0 = vmmov 0   ;;  %vm341_vm1 = vcmask 523264   ;;  %s793_s1 = inlined_call_operand.vmem [shape: bf16[576,128], index: 1, kind: input, shape index: {}]   ;;  %s794_s0 = inlined_call_operand.vmem [shape: bf16[16,576], index: 0, kind: input, shape index: {}]   ;;  %s795_s2 = inlined_call_operand.vmem [shape: f32[1,128], index: 2, kind: input, shape index: {}]   ;;  %s796_s3 = inlined_call_operand.vmem [shape: bf16[16,128], index: 3, kind: output, shape index: {}]  }
   0x1   :  { %v599_v0 = vld [vmem:[%s793_s1 + $0x78] sm:$0xff]   ;;  %v603_v4 = vld [vmem:[%s793_s1 + $0x70] sm:$0xff]   ;;  %v607_v8 = vld [vmem:[%s793_s1 + $0x68] sm:$0xff]  }
   0x2   :  { %v600_v1 = vld [vmem:[%s793_s1 + $0x38] sm:$0xff]   ;;  %536 = vmatprep.subr.bf16.mxu0 %v599_v0  ;;  %v604_v5 = vld [vmem:[%s793_s1 + $0x30] sm:$0xff]   ;;  %v608_v9 = vld [vmem:[%s793_s1 + $0x28] sm:$0xff]  }
   0x3   :  { %v601_v2 = vld [vmem:[%s793_s1 + $0xf8] sm:$0xff]   ;;  %537 = vmatpush3.bf16.msra.mxu0 %v600_v1  ;;  %v605_v6 = vld [vmem:[%s793_s1 + $0xf0] sm:$0xff]   ;;  %v609_v10 = vld [vmem:[%s793_s1 + $0xe8] sm:$0xff]  }
   0x4   :  { %v602_v3 = vld [vmem:[%s793_s1 + $0xb8] sm:$0xff]   ;;  %558 = vmatprep.subr.bf16.mxu1 %v601_v2  ;;  %538 = vmatprep.subr.bf16.mxu0 %v603_v4  ;;  %v606_v7 = vld [vmem:[%s793_s1 + $0xb0] sm:$0xff]   ;;  %v610_v11 = vld [vmem:[%s793_s1 + $0xa8] sm:$0xff]  }
   0x5   :  { %559 = vmatpush3.bf16.msra.mxu1 %v602_v3  ;;  %v611_v12 = vld [vmem:[%s793_s1 + $0x60] sm:$0xff]   ;;  %v615_v16 = vld [vmem:[%s793_s1 + $0x58] sm:$0xff]   ;;  %v619_v20 = vld [vmem:[%s793_s1 + $0x50] sm:$0xff]  }
   0x6   :  { %560 = vmatprep.subr.bf16.mxu1 %v605_v6  ;;  %v612_v13 = vld [vmem:[%s793_s1 + $0x20] sm:$0xff]   ;;  %v616_v17 = vld [vmem:[%s793_s1 + $0x18] sm:$0xff]   ;;  %v620_v21 = vld [vmem:[%s793_s1 + $0x10] sm:$0xff]  }
   0x7   :  { %539 = vmatpush3.bf16.msra.mxu0 %v604_v5  ;;  %v613_v14 = vld [vmem:[%s793_s1 + $0xe0] sm:$0xff]   ;;  %v617_v18 = vld [vmem:[%s793_s1 + $0xd8] sm:$0xff]   ;;  %v621_v22 = vld [vmem:[%s793_s1 + $0xd0] sm:$0xff]  }
   0x8   :  { %540 = vmatprep.subr.bf16.mxu0 %v607_v8  ;;  %v614_v15 = vld [vmem:[%s793_s1 + $0xa0] sm:$0xff]   ;;  %v618_v19 = vld [vmem:[%s793_s1 + $0x98] sm:$0xff]   ;;  %v622_v23 = vld [vmem:[%s793_s1 + $0x90] sm:$0xff]  }
   0x9   :  { %561 = vmatpush3.bf16.msra.mxu1 %v606_v7  ;;  %v623_v24 = vld [vmem:[%s793_s1 + $0x48] sm:$0xff]   ;;  %v627_v28 = vld [vmem:[%s793_s1 + $0x40] sm:$0xff]   ;;  %v637_v37 = vld [vmem:[%s793_s1 + $0x118] sm:$0xff]  }
   0xa   :  { %562 = vmatprep.subr.bf16.mxu1 %v609_v10  ;;  %v624_v25 = vld [vmem:[%s793_s1 + $0x8] sm:$0xff]   ;;  %v628_v29 = vld [vmem:[%s793_s1] sm:$0xff]   ;;  %v638_v38 = vld [vmem:[%s793_s1 + $0x110] sm:$0xff]  }
   0xb   :  { %541 = vmatpush3.bf16.msra.mxu0 %v608_v9  ;;  %v625_v26 = vld [vmem:[%s793_s1 + $0xc8] sm:$0xff]   ;;  %v629_v30 = vld [vmem:[%s793_s1 + $0xc0] sm:$0xff]  }
   0xc   :  { %542 = vmatprep.subr.bf16.mxu0 %v611_v12  ;;  %v626_v27 = vld [vmem:[%s793_s1 + $0x88] sm:$0xff]   ;;  %v630_v31 = vld [vmem:[%s794_s0] ss:$20 sps:$4 sm:$0xff]   ;;  %v632_v32 = vld [vmem:[%s794_s0 + $0x4] ss:$20 sps:$4 sm:$0xff]  }
   0xd   :  { %563 = vmatpush3.bf16.msra.mxu1 %v610_v11  ;;  %v633_v34 = vld [vmem:[%s793_s1 + $0x80] sm:$0xff]   ;;  %377 = vmatprep.mubr.bf16.mxu0 %v632_v32  ;;  %v634_v35 = vld [vmem:[%s794_s0 + $0x8] ss:$20 sps:$4 sm:$0xff]  }
   0xe   :  { %564 = vmatprep.subr.bf16.mxu1 %v613_v14  ;;  %v636_v36 = vld [vmem:[%s794_s0 + $0xc] ss:$20 sps:$4 sm:$0xff]   ;;  %v641_v41 = vld [vmem:[%s794_s0 + $0x10] ss:$20 sps:$4 sm:$0xff]  }
   0xf   :  { %543 = vmatpush3.bf16.msra.mxu0 %v612_v13  ;;  %418 = vmatprep.mubr.bf16.mxu1 %v636_v36  ;;  %v639_v39 = vld [vmem:[%s793_s1 + $0x108] sm:$0xff]   ;;  %v640_v40 = vld [vmem:[%s793_s1 + $0x100] sm:$0xff]  }
  0x10   :  { %544 = vmatprep.subr.bf16.mxu0 %v615_v16  ;;  %v484_v50 = vld [vmem:[%s795_s2] ss:$0 sm:$0xff] }
  0x11   :  { %565 = vmatpush3.bf16.msra.mxu1 %v614_v15 }
  0x12   :  { %566 = vmatprep.subr.bf16.mxu1 %v617_v18 }
  0x13   :  { %545 = vmatpush3.bf16.msra.mxu0 %v616_v17 }
  0x14   :  { %546 = vmatprep.subr.bf16.mxu0 %v619_v20 }
  0x15   :  { %567 = vmatpush3.bf16.msra.mxu1 %v618_v19 }
  0x16   :  { %568 = vmatprep.subr.bf16.mxu1 %v621_v22 }
  0x17   :  { %547 = vmatpush3.bf16.msra.mxu0 %v620_v21 }
  0x18   :  { %548 = vmatprep.subr.bf16.mxu0 %v623_v24 }
  0x19   :  { %569 = vmatpush3.bf16.msra.mxu1 %v622_v23 }
  0x1a   :  { %570 = vmatprep.subr.bf16.mxu1 %v625_v26 }
  0x1b   :  { %549 = vmatpush3.bf16.msra.mxu0 %v624_v25 }
  0x1c   :  { %550 = vmatprep.subr.bf16.mxu0 %v627_v28 }
  0x1d   :  { %571 = vmatpush3.bf16.msra.mxu1 %v626_v27 }
  0x1e   :  { %572 = vmatprep.subr.bf16.mxu1 %v629_v30 }
  0x1f   :  { %551 = vmatpush3.bf16.msra.mxu0 %v628_v29 }
  0x20   :  { %585 = vmatprep.subr.bf16.mxu0 %v642_v33 }
  0x21   :  { %573 = vmatpush3.bf16.msra.mxu1 %v633_v34 }
  0x22   :  { %378 = vmatmul.mubr.bf16.vlgmr.msra.gmra.mxu0 %v630_v31 }
  0x23   :  { %593 = vmatprep.mubr.msk.bf16.mxu0 %vm643_vm0, %v642_v33  ;;  %586 = vmatpush3.bf16.msra.mxu0 %v637_v37 }
  0x24   :  { %419 = vmatmul.mubr.bf16.vlgmr.msra.gmra.mxu1 %v634_v35  ;;  %587 = vmatprep.subr.bf16.mxu0 %v642_v33 }
  0x27   :  { %588 = vmatpush3.bf16.msra.mxu0 %v638_v38 }
  0x28   :  { %589 = vmatprep.subr.bf16.mxu0 %v642_v33 }
  0x2b   :  { %590 = vmatpush3.bf16.msra.mxu0 %v639_v39 }
  0x2c   :  { %591 = vmatprep.subr.bf16.mxu0 %v642_v33 }
  0x2f   :  { %592 = vmatpush3.bf16.msra.mxu0 %v640_v40 }
  0x32   :  { %594 = vmatmul.mubr.msk.bf16.vlgmr.msra.gmra.mxu0 %vm341_vm1, %v641_v41 }
  0xe2   :  { %v552_v42 = vpop.f32.mrf.mxu0 }
  0xe4   :  { %v553_v43 = vpop.f32.mrf.mxu0  ;;  %v574_v44 = vpop.f32.mrf.mxu1 }
  0xe5   :  { %v554_v49 = vadd.f32 %v553_v43, %v552_v42 }
  0xe6   :  { %v555_v45 = vpop.f32.mrf.mxu0  ;;  %v575_v46 = vpop.f32.mrf.mxu1 }
  0xe7   :  { %v380_v53 = vadd.f32 %v554_v49, %v484_v50  ;;  %v576_v54 = vadd.f32 %v575_v46, %v574_v44 }
  0xe8   :  { %v556_v47 = vpop.f32.mrf.mxu0  ;;  %v577_v48 = vpop.f32.mrf.mxu1 }
  0xe9   :  { %v557_v51 = vadd.f32 %v556_v47, %v555_v45  ;;  %v421_v58 = vadd.f32 %v576_v54, %v380_v53 }
  0xea   :  { %v578_v52 = vpop.f32.mrf.mxu1 }
  0xeb   :  { %v383_v55 = vadd.f32 %v557_v51, %v484_v50  ;;  %v579_v56 = vadd.f32 %v578_v52, %v577_v48 }
  0xed   :  { %v424_v61 = vadd.f32 %v579_v56, %v383_v55 }
  0xf2   :  { %v461_v57 = vpop.f32.mrf.mxu0 }
  0xf3   :  { %v462_v60 = vadd.f32 %v461_v57, %v421_v58 }
  0xf4   :  { %v595_v59 = vpop.f32.mrf.mxu0 }
  0xf5   :  { %v468_v1 = vmax.f32 %v462_v60, 0.0 }
  0xf6   :  { %v464_v62 = vpop.f32.mrf.mxu0 }
  0xf7   :  { %v465_v63 = vadd.f32 %v464_v62, %v424_v61 }
  0xf8   :  { %v596_v0 = vpop.f32.mrf.mxu0 }
  0xf9   :  { %v469_v2 = vmax.f32 %v465_v63, 0.0 }
  0xfb   :  { %v534_v3 = vpack.c.bf16 %v469_v2, %v468_v1 }
  0xfd   :  { %535 = vst [vmem:[%s796_s3] sm:$0xff] %v534_v3  }

// kernel: dqn_forward.7
= control target key start
LH: loop header
LB: loop body
LE: loop exit
PB: predicated region body
PF: predicated region fallthrough
CT: control target
= control target key end

     0   :  { %v753_v1 = vmov 0   ;;  %vm146_vm0 = vcmask 523264   ;;  %v41_v50 = vlaneseq  ;;  %s943_s1 = inlined_call_operand.vmem [shape: bf16[64,512], index: 1, kind: input, shape index: {}]   ;;  %s944_s0 = inlined_call_operand.vmem [shape: bf16[16,64], index: 0, kind: input, shape index: {}]   ;;  %s945_s3 = inlined_call_operand.vmem [shape: bf16[512,128], index: 3, kind: input, shape index: {}]   ;;  %s946_s2 = inlined_call_operand.vmem [shape: f32[1,512], index: 2, kind: input, shape index: {}]   ;;  %s947_s4 = inlined_call_operand.vmem [shape: f32[1,128], index: 4, kind: input, shape index: {}]   ;;  %s948_s5 = inlined_call_operand.vmem [shape: f32[16,128], index: 5, kind: output, shape index: {}]  }
   0x1   :  { %v696_v0 = vld [vmem:[%s943_s1 + $0x64] ss:$16 sps:$4 sm:$0xff]   ;;  %182 = vmatprep.mubr.bf16.mxu0 %v753_v1  ;;  %225 = vmatprep.mubr.bf16.mxu1 %v753_v1  ;;  %v698_v2 = vld [vmem:[%s943_s1 + $0x6c] ss:$16 sps:$4 sm:$0xff]   ;;  %v700_v3 = vld [vmem:[%s943_s1 + $0x60] ss:$16 sps:$4 sm:$0xff]  }
   0x2   :  { %158 = vmatprep.subr.bf16.mxu0 %v696_v0  ;;  %v701_v4 = vld [vmem:[%s943_s1 + $0x68] ss:$16 sps:$4 sm:$0xff]   ;;  %201 = vmatprep.subr.bf16.mxu1 %v698_v2  ;;  %v702_v5 = vld [vmem:[%s943_s1 + $0x44] ss:$16 sps:$4 sm:$0xff]   ;;  %v704_v6 = vld [vmem:[%s943_s1 + $0x4c] ss:$16 sps:$4 sm:$0xff]  }
   0x3   :  { %159 = vmatpush1.bf16.msra.mxu0 %v700_v3  ;;  %202 = vmatpush1.bf16.msra.mxu1 %v701_v4  ;;  %v706_v7 = vld [vmem:[%s943_s1 + $0x40] ss:$16 sps:$4 sm:$0xff]   ;;  %v707_v8 = vld [vmem:[%s943_s1 + $0x48] ss:$16 sps:$4 sm:$0xff]   ;;  %v708_v9 = vld [vmem:[%s943_s1 + $0x24] ss:$16 sps:$4 sm:$0xff]  }
   0x4   :  { %160 = vmatprep.subr.bf16.mxu0 %v702_v5  ;;  %203 = vmatprep.subr.bf16.mxu1 %v704_v6  ;;  %v710_v10 = vld [vmem:[%s943_s1 + $0x2c] ss:$16 sps:$4 sm:$0xff]   ;;  %v712_v11 = vld [vmem:[%s943_s1 + $0x20] ss:$16 sps:$4 sm:$0xff]   ;;  %v713_v12 = vld [vmem:[%s943_s1 + $0x28] ss:$16 sps:$4 sm:$0xff]  }
   0x5   :  { %v714_v13 = vld [vmem:[%s943_s1 + $0x4] ss:$16 sps:$4 sm:$0xff]   ;;  %v716_v14 = vld [vmem:[%s943_s1 + $0xc] ss:$16 sps:$4 sm:$0xff]   ;;  %v718_v15 = vld [vmem:[%s943_s1] ss:$16 sps:$4 sm:$0xff]  }
   0x6   :  { %v719_v16 = vld [vmem:[%s943_s1 + $0x8] ss:$16 sps:$4 sm:$0xff]   ;;  %v720_v18 = vld [vmem:[%s944_s0] sm:$0xff]   ;;  %v725_v22 = vld [vmem:[%s945_s3 + $0x70] sm:$0xff]   ;;  %v42_v51 = vshrl.u32 %v41_v50, 7 }
   0x7   :  { %161 = vmatpush1.bf16.msra.mxu0 %v706_v7  ;;  %204 = vmatpush1.bf16.msra.mxu1 %v707_v8  ;;  %v721_v17 = vld [vmem:[%s945_s3 + $0x78] sm:$0xff]   ;;  %v726_v23 = vld [vmem:[%s945_s3 + $0xf0] sm:$0xff]   ;;  %v729_v26 = vld [vmem:[%s945_s3 + $0x68] sm:$0xff]  }
   0x8   :  { %162 = vmatprep.subr.bf16.mxu0 %v708_v9  ;;  %205 = vmatprep.subr.bf16.mxu1 %v710_v10  ;;  %v722_v19 = vld [vmem:[%s945_s3 + $0xf8] sm:$0xff]   ;;  %v727_v24 = vld [vmem:[%s945_s3 + $0x30] sm:$0xff]   ;;  %v730_v27 = vld [vmem:[%s945_s3 + $0xe8] sm:$0xff]   ;;  %v47_v52 = vsub.s32 1, %v42_v51  ;;  %v55_v53 = vsub.s32 3, %v42_v51  ;;  %v43_v54 = vsub.s32 0, %v42_v51 }
   0x9   :  { %v723_v20 = vld [vmem:[%s945_s3 + $0x38] sm:$0xff]   ;;  %v728_v25 = vld [vmem:[%s945_s3 + $0xb0] sm:$0xff]   ;;  %v731_v28 = vld [vmem:[%s945_s3 + $0x28] sm:$0xff]   ;;  %v51_v55 = vsub.s32 2, %v42_v51 }
   0xa   :  { %v724_v21 = vld [vmem:[%s945_s3 + $0xb8] sm:$0xff]   ;;  %v732_v29 = vld [vmem:[%s945_s3 + $0xa8] sm:$0xff]   ;;  %v733_v30 = vld [vmem:[%s945_s3 + $0x60] sm:$0xff]  }
   0xb   :  { %163 = vmatpush1.bf16.msra.mxu0 %v712_v11  ;;  %206 = vmatpush1.bf16.msra.mxu1 %v713_v12  ;;  %v734_v31 = vld [vmem:[%s945_s3 + $0xe0] sm:$0xff]   ;;  %v737_v34 = vld [vmem:[%s945_s3 + $0x58] sm:$0xff]   ;;  %v741_v38 = vld [vmem:[%s945_s3 + $0x50] sm:$0xff]  }
   0xc   :  { %164 = vmatprep.subr.bf16.mxu0 %v714_v13  ;;  %207 = vmatprep.subr.bf16.mxu1 %v716_v14  ;;  %v735_v32 = vld [vmem:[%s945_s3 + $0x20] sm:$0xff]   ;;  %v738_v35 = vld [vmem:[%s945_s3 + $0xd8] sm:$0xff]   ;;  %v742_v39 = vld [vmem:[%s945_s3 + $0xd0] sm:$0xff]  }
   0xd   :  { %v736_v33 = vld [vmem:[%s945_s3 + $0xa0] sm:$0xff]   ;;  %v739_v36 = vld [vmem:[%s945_s3 + $0x18] sm:$0xff]   ;;  %v743_v40 = vld [vmem:[%s945_s3 + $0x10] sm:$0xff]  }
   0xe   :  { %v740_v37 = vld [vmem:[%s945_s3 + $0x98] sm:$0xff]   ;;  %v744_v41 = vld [vmem:[%s945_s3 + $0x90] sm:$0xff]   ;;  %v745_v42 = vld [vmem:[%s945_s3 + $0x48] sm:$0xff]  }
   0xf   :  { %165 = vmatpush1.bf16.msra.mxu0 %v718_v15  ;;  %208 = vmatpush1.bf16.msra.mxu1 %v719_v16  ;;  %v746_v43 = vld [vmem:[%s945_s3 + $0xc8] sm:$0xff]   ;;  %v749_v46 = vld [vmem:[%s945_s3 + $0x40] sm:$0xff]  }
  0x10   :  { %651 = vmatprep.subr.bf16.mxu0 %v721_v17  ;;  %673 = vmatprep.subr.bf16.mxu1 %v722_v19  ;;  %v747_v44 = vld [vmem:[%s945_s3 + $0x8] sm:$0xff]   ;;  %v750_v47 = vld [vmem:[%s945_s3 + $0xc0] sm:$0xff]  }
  0x11   :  { %v748_v45 = vld [vmem:[%s945_s3 + $0x88] sm:$0xff]   ;;  %v751_v48 = vld [vmem:[%s945_s3] sm:$0xff]  }
  0x12   :  { %616 = vmatmul.mubr.msk.bf16.vlgmr.msra.gmra.mxu0 %vm146_vm0, %v720_v18  ;;  %617 = vmatmul.mubr.msk.bf16.vlgmr.msra.gmra.mxu1 %vm146_vm0, %v720_v18  ;;  %v752_v49 = vld [vmem:[%s945_s3 + $0x80] sm:$0xff]  }
  0x13   :  { %652 = vmatpush3.bf16.msra.mxu0 %v723_v20  ;;  %674 = vmatpush3.bf16.msra.mxu1 %v724_v21  ;;  %v39_v56 = vld [vmem:[%s946_s2] sm:$0xf] }
  0x14   :  { %653 = vmatprep.subr.bf16.mxu0 %v725_v22  ;;  %675 = vmatprep.subr.bf16.mxu1 %v726_v23  ;;  %v48_v59 = vrot.slane %v39_v56, %v47_v52  ;;  %v56_v60 = vrot.slane %v39_v56, %v55_v53  ;;  %v44_v61 = vrot.slane %v39_v56, %v43_v54 }
  0x15   :  { %v52_v62 = vrot.slane %v39_v56, %v51_v55 }
  0x17   :  { %654 = vmatpush3.bf16.msra.mxu0 %v727_v24  ;;  %676 = vmatpush3.bf16.msra.mxu1 %v728_v25 }
  0x18   :  { %655 = vmatprep.subr.bf16.mxu0 %v729_v26  ;;  %677 = vmatprep.subr.bf16.mxu1 %v730_v27  ;;  %v618_v27 = vld [vmem:[%s947_s4] ss:$0 sm:$0xff] }
  0x1b   :  { %656 = vmatpush3.bf16.msra.mxu0 %v731_v28  ;;  %678 = vmatpush3.bf16.msra.mxu1 %v732_v29 }
  0x1c   :  { %657 = vmatprep.subr.bf16.mxu0 %v733_v30  ;;  %679 = vmatprep.subr.bf16.mxu1 %v734_v31 }
  0x1f   :  { %658 = vmatpush3.bf16.msra.mxu0 %v735_v32  ;;  %680 = vmatpush3.bf16.msra.mxu1 %v736_v33 }
  0x20   :  { %659 = vmatprep.subr.bf16.mxu0 %v737_v34  ;;  %681 = vmatprep.subr.bf16.mxu1 %v738_v35 }
  0x23   :  { %660 = vmatpush3.bf16.msra.mxu0 %v739_v36  ;;  %682 = vmatpush3.bf16.msra.mxu1 %v740_v37 }
  0x24   :  { %661 = vmatprep.subr.bf16.mxu0 %v741_v38  ;;  %683 = vmatprep.subr.bf16.mxu1 %v742_v39 }
  0x27   :  { %662 = vmatpush3.bf16.msra.mxu0 %v743_v40  ;;  %684 = vmatpush3.bf16.msra.mxu1 %v744_v41 }
  0x28   :  { %663 = vmatprep.subr.bf16.mxu0 %v745_v42  ;;  %685 = vmatprep.subr.bf16.mxu1 %v746_v43 }
  0x2b   :  { %664 = vmatpush3.bf16.msra.mxu0 %v747_v44  ;;  %686 = vmatpush3.bf16.msra.mxu1 %v748_v45 }
  0x2c   :  { %665 = vmatprep.subr.bf16.mxu0 %v749_v46  ;;  %687 = vmatprep.subr.bf16.mxu1 %v750_v47 }
  0x2f   :  { %666 = vmatpush3.bf16.msra.mxu0 %v751_v48  ;;  %688 = vmatpush3.bf16.msra.mxu1 %v752_v49 }
  0xd2   :  { %v184_v57 = vpop.f32.mrf.mxu0  ;;  %v227_v58 = vpop.f32.mrf.mxu1 }
  0xd3   :  { %v185_v7 = vadd.f32 %v184_v57, %v44_v61  ;;  %v228_v8 = vadd.f32 %v227_v58, %v52_v62 }
  0xd4   :  { %v186_v63 = vpop.f32.mrf.mxu0  ;;  %v229_v0 = vpop.f32.mrf.mxu1 }
  0xd5   :  { %v187_v3 = vadd.f32 %v186_v63, %v48_v59  ;;  %v230_v4 = vadd.f32 %v229_v0, %v56_v60  ;;  %v236_v19 = vmax.f32 %v185_v7, 0.0  ;;  %v238_v20 = vmax.f32 %v228_v8, 0.0 }
  0xd6   :  { %v188_v1 = vpop.f32.mrf.mxu0  ;;  %v231_v2 = vpop.f32.mrf.mxu1 }
  0xd7   :  { %v189_v5 = vadd.f32 %v188_v1, %v44_v61  ;;  %v232_v6 = vadd.f32 %v231_v2, %v52_v62  ;;  %v237_v15 = vmax.f32 %v187_v3, 0.0  ;;  %v239_v16 = vmax.f32 %v230_v4, 0.0 }
  0xd8   :  { %v190_v9 = vpop.f32.mrf.mxu0  ;;  %v233_v10 = vpop.f32.mrf.mxu1 }
  0xd9   :  { %v191_v11 = vadd.f32 %v190_v9, %v48_v59  ;;  %v234_v12 = vadd.f32 %v233_v10, %v56_v60  ;;  %v240_v13 = vmax.f32 %v189_v5, 0.0  ;;  %v242_v14 = vmax.f32 %v232_v6, 0.0 }
  0xdb   :  { %v241_v17 = vmax.f32 %v191_v11, 0.0  ;;  %v243_v18 = vmax.f32 %v234_v12, 0.0  ;;  %v244_v23 = vpack.c.bf16 %v240_v13, %v236_v19  ;;  %v246_v24 = vpack.c.bf16 %v242_v14, %v238_v20 }
  0xdd   :  { %v245_v21 = vpack.c.bf16 %v241_v17, %v237_v15  ;;  %v247_v22 = vpack.c.bf16 %v243_v18, %v239_v16 }
  0xdf   :  { %543 = vmatprep.mubr.bf16.mxu0 %v245_v21  ;;  %584 = vmatprep.mubr.bf16.mxu1 %v247_v22 }
  0xe0   :  { %544 = vmatmul.mubr.bf16.vlgmr.msra.gmra.mxu0 %v244_v23  ;;  %585 = vmatmul.mubr.bf16.vlgmr.msra.gmra.mxu1 %v246_v24 }
 0x1a0   :  { %v667_v25 = vpop.f32.mrf.mxu0  ;;  %v689_v26 = vpop.f32.mrf.mxu1 }
 0x1a2   :  { %v668_v28 = vpop.f32.mrf.mxu0  ;;  %v690_v29 = vpop.f32.mrf.mxu1 }
 0x1a3   :  { %v669_v30 = vadd.f32 %v668_v28, %v667_v25  ;;  %v691_v34 = vadd.f32 %v690_v29, %v689_v26 }
 0x1a4   :  { %v670_v31 = vpop.f32.mrf.mxu0  ;;  %v692_v32 = vpop.f32.mrf.mxu1 }
 0x1a5   :  { %v546_v33 = vadd.f32 %v669_v30, %v618_v27 }
 0x1a6   :  { %v671_v35 = vpop.f32.mrf.mxu0  ;;  %v693_v36 = vpop.f32.mrf.mxu1 }
 0x1a7   :  { %v587_v37 = vadd.f32 %v691_v34, %v546_v33  ;;  %v672_v38 = vadd.f32 %v671_v35, %v670_v31  ;;  %v694_v40 = vadd.f32 %v693_v36, %v692_v32 }
 0x1a9   :  { %593 = vst [vmem:[%s948_s5] sm:$0xff] %v587_v37  ;;  %v549_v39 = vadd.f32 %v672_v38, %v618_v27 }
 0x1ab   :  { %v590_v41 = vadd.f32 %v694_v40, %v549_v39 }
 0x1ad   :  { %594 = vst [vmem:[%s948_s5 + $0x8] sm:$0xff] %v590_v41 }

</bundles_post_ra>
